<compile_context>
chip_gen: v7x
topology: tpu7x:2x2x1
jax: 0.10.0
libtpu: 0.0.40
codegen_flags: <defaults>
</compile_context>

<pallas_src>
from functools import partial

import jax
import jax.numpy as jnp
from jax.experimental import pallas as pl
from jax.experimental.pallas import tpu as pltpu

_LANE = 128
_SUBLANE = 8
_VMEM_LIMIT = 48 * 1024 * 1024  # < 64 MiB physical on v7x, > default scoped limit


def _round_up(x, m):
    return ((x + m - 1) // m) * m


def _pad2d(a, rows, cols):
    r, c = a.shape
    return jnp.pad(a, ((0, rows - r), (0, cols - c)))


def _resident(shape):
    """BlockSpec whose block == full array, same block at every grid step."""
    nd = len(shape)
    return pl.BlockSpec(shape, lambda i: (0,) * nd)


# ----------------------------------------------------------------------------
# Kernel 1: first Linear + per-tile partial batch statistics (fully parallel)
# ----------------------------------------------------------------------------
def _stats_kernel(x_ref, w1_ref, b1_ref, h_ref, stats_ref, *,
                  tile_n, n_true, compute_dtype):
    i = pl.program_id(0)

    x = x_ref[...]
    w = w1_ref[...]
    if compute_dtype is not None:
        x = x.astype(compute_dtype)
        w = w.astype(compute_dtype)
    h = jnp.dot(x, w, preferred_element_type=jnp.float32) + b1_ref[...]
    h_ref[...] = h.astype(h_ref.dtype)

    # Mask rows beyond the true batch size so they don't pollute the BN stats.
    row_ids = jax.lax.broadcasted_iota(jnp.int32, h.shape, 0) + i * tile_n
    hm = jnp.where(row_ids < n_true, h, 0.0)
    s = jnp.sum(hm, axis=0, keepdims=True)        # (1, H_p) partial sum
    q = jnp.sum(hm * hm, axis=0, keepdims=True)   # (1, H_p) partial sum of squares

    # Pack the two stat rows into an (8, H_p) sublane-aligned block:
    # row 0 = sum, row 1 = sum-of-squares, rows 2..7 = 0.  Pure VPU selects.
    hp = h.shape[1]
    rid = jax.lax.broadcasted_iota(jnp.int32, (8, hp), 0)
    stats = jnp.where(rid == 0, s, 0.0) + jnp.where(rid == 1, q, 0.0)
    stats_ref[...] = stats[None, :, :]


# ----------------------------------------------------------------------------
# Kernel 2: BN affine (pre-folded scale/shift) + ReLU + middle layers + final Linear
# ----------------------------------------------------------------------------
def _mlp_tail_kernel(h_ref, scale_ref, shift_ref, *rest, num_middle, compute_dtype):
    if num_middle > 0:
        wm_ref, bm_ref, wf_ref, bf_ref, out_ref = rest
    else:
        wf_ref, bf_ref, out_ref = rest

    # Single FMA applies BatchNorm; Dropout p=0 is identity.
    h = jnp.maximum(h_ref[...] * scale_ref[...] + shift_ref[...], 0.0)

    def matmul(a, w):
        if compute_dtype is not None:
            a = a.astype(compute_dtype)
            w = w.astype(compute_dtype)
        return jnp.dot(a, w, preferred_element_type=jnp.float32)

    if num_middle > 0:
        def body(l, hh):
            hh = matmul(hh, wm_ref[l]) + bm_ref[l]
            return jnp.maximum(hh, 0.0)
        h = jax.lax.fori_loop(0, num_middle, body, h)

    out_ref[...] = (matmul(h, wf_ref[...]) + bf_ref[...]).astype(out_ref.dtype)


# ----------------------------------------------------------------------------
# Wrapper
# ----------------------------------------------------------------------------
def mlp_forward(x, params, num_middle, *, tile_n=256, eps=1e-5, compute_dtype=None):
    """params is a flat list: [w1, b1, gamma, beta, (w_mid, b_mid)*, w_out, b_out].

    Weights are [in_features, out_features]; biases / BN params are [1, features].
    """
    n, d = x.shape
    w1, b1, gamma, beta = params[0], params[1], params[2], params[3]
    h_dim = w1.shape[1]
    idx = 4
    w_mids, b_mids = [], []
    for _ in range(num_middle):
        w_mids.append(params[idx])
        b_mids.append(params[idx + 1])
        idx += 2
    wf, bf = params[idx], params[idx + 1]
    o_dim = wf.shape[1]

    # --- pad to hardware-friendly shapes ---
    d_p = _round_up(d, _LANE)
    h_p = _round_up(h_dim, _LANE)
    o_p = _round_up(o_dim, _LANE)
    tile_n = _round_up(max(_SUBLANE, min(tile_n, _round_up(n, _SUBLANE))), _SUBLANE)
    n_p = _round_up(n, tile_n)
    n_tiles = n_p // tile_n

    x_p = _pad2d(x.astype(jnp.float32), n_p, d_p)
    w1_p = _pad2d(w1, d_p, h_p)
    b1_p = _pad2d(b1, 1, h_p)
    g_p = _pad2d(gamma, 1, h_p)
    be_p = _pad2d(beta, 1, h_p)
    wf_p = _pad2d(wf, h_p, o_p)
    bf_p = _pad2d(bf, 1, o_p)

    # --- pass 1: first Linear + per-tile partial batch statistics ---
    stats_kernel = partial(_stats_kernel, tile_n=tile_n, n_true=n,
                           compute_dtype=compute_dtype)
    h1, stats = pl.pallas_call(
        stats_kernel,
        grid=(n_tiles,),
        in_specs=[
            pl.BlockSpec((tile_n, d_p), lambda i: (i, 0)),   # x tile
            _resident((d_p, h_p)),                           # W1 (resident)
            _resident((1, h_p)),                             # b1 (resident)
        ],
        out_specs=[
            pl.BlockSpec((tile_n, h_p), lambda i: (i, 0)),   # h1 tile
            pl.BlockSpec((1, 8, h_p), lambda i: (i, 0, 0)),  # per-tile stats block
        ],
        out_shape=[
            jax.ShapeDtypeStruct((n_p, h_p), jnp.float32),
            jax.ShapeDtypeStruct((n_tiles, 8, h_p), jnp.float32),
        ],
        compiler_params=pltpu.CompilerParams(
            dimension_semantics=("parallel",),
            vmem_limit_bytes=_VMEM_LIMIT,
        ),
    )(x_p, w1_p, b1_p)

    # --- fold stats into one per-feature scale/shift (tiny XLA op, fused under jit)
    inv_n = jnp.float32(1.0 / n)
    s = jnp.sum(stats[:, 0, :], axis=0, keepdims=True)
    q = jnp.sum(stats[:, 1, :], axis=0, keepdims=True)
    mean = s * inv_n
    var = jnp.maximum(q * inv_n - mean * mean, 0.0)   # biased (training-mode) variance
    scale = g_p * jax.lax.rsqrt(var + jnp.float32(eps))
    shift = be_p - mean * scale

    # --- pass 2: BN affine + ReLU + middle layers + final Linear ---
    tail_kernel = partial(_mlp_tail_kernel, num_middle=num_middle,
                          compute_dtype=compute_dtype)

    in_specs = [
        pl.BlockSpec((tile_n, h_p), lambda i: (i, 0)),  # h1 tile
        _resident((1, h_p)),                            # scale (resident)
        _resident((1, h_p)),                            # shift (resident)
    ]
    args = [h1, scale, shift]
    if num_middle > 0:
        wm = jnp.stack([_pad2d(w, h_p, h_p) for w in w_mids])   # [L, H_p, H_p]
        bm = jnp.stack([_pad2d(b, 1, h_p) for b in b_mids])     # [L, 1, H_p]
        in_specs += [_resident((num_middle, h_p, h_p)),
                     _resident((num_middle, 1, h_p))]
        args += [wm, bm]
    in_specs += [_resident((h_p, o_p)), _resident((1, o_p))]
    args += [wf_p, bf_p]

    out_p = pl.pallas_call(
        tail_kernel,
        grid=(n_tiles,),
        in_specs=in_specs,
        out_specs=pl.BlockSpec((tile_n, o_p), lambda i: (i, 0)),
        out_shape=jax.ShapeDtypeStruct((n_p, o_p), jnp.float32),
        compiler_params=pltpu.CompilerParams(
            dimension_semantics=("parallel",),
            vmem_limit_bytes=_VMEM_LIMIT,
        ),
    )(*args)

    return out_p[:n, :o_dim]


# ----------------------------------------------------------------------------
# Parameter init mimicking the PyTorch module's layer shapes
# ----------------------------------------------------------------------------
def init_mlp_params(key, input_dim, hidden_dim, output_dim, num_layers):
    num_middle = max(0, num_layers - 2)
    keys = jax.random.split(key, 2 * (2 + num_middle))
    ki = iter(range(len(keys)))

    def linear(fan_in, fan_out):
        bound = 1.0 / jnp.sqrt(jnp.float32(fan_in))
        w = jax.random.uniform(keys[next(ki)], (fan_in, fan_out), jnp.float32,
                               minval=-bound, maxval=bound)
        b = jax.random.uniform(keys[next(ki)], (1, fan_out), jnp.float32,
                               minval=-bound, maxval=bound)
        return w, b

    params = []
    w1, b1 = linear(input_dim, hidden_dim)
    params += [w1, b1]
    # BatchNorm1d(hidden_dim): gamma=1, beta=0 (PyTorch default init)
    params += [jnp.ones((1, hidden_dim), jnp.float32),
               jnp.zeros((1, hidden_dim), jnp.float32)]
    for _ in range(num_middle):
        w, b = linear(hidden_dim, hidden_dim)
        params += [w, b]
    wf, bf = linear(hidden_dim, output_dim)
    params += [wf, bf]
    return params, num_middle


def mlp_reference(x, params, num_middle, eps=1e-5):
    """Pure-JAX reference (training-mode BN, biased variance, dropout p=0)."""
    w1, b1, g, be = params[0], params[1], params[2], params[3]
    h = x @ w1 + b1
    mean = jnp.mean(h, axis=0, keepdims=True)
    var = jnp.mean((h - mean) ** 2, axis=0, keepdims=True)
    h = (h - mean) / jnp.sqrt(var + eps) * g + be
    h = jnp.maximum(h, 0.0)
    idx = 4
    for _ in range(num_middle):
        w, b = params[idx], params[idx + 1]
        idx += 2
        h = jnp.maximum(h @ w + b, 0.0)
    wf, bf = params[idx], params[idx + 1]
    return h @ wf + bf


if __name__ == "__main__":
    # Small shapes consistent with the module; batch chosen to exercise the
    # multi-tile grid + non-divisible-batch masking path.
    batch = 200
    input_dim, hidden_dim, output_dim = 16, 32, 8
    num_layers = 3          # -> one middle Linear(hidden, hidden) block
    # dropout = 0.0 (module default) -> identity

    key = jax.random.PRNGKey(0)
    kx, kp = jax.random.split(key)
    x = jax.random.normal(kx, (batch, input_dim), jnp.float32)
    params, num_middle = init_mlp_params(kp, input_dim, hidden_dim, output_dim,
                                         num_layers)

    fwd = jax.jit(lambda xx, pp: mlp_forward(xx, pp, num_middle, tile_n=128))
    out = fwd(x, params)
    out = jax.block_until_ready(out)

    ref = mlp_reference(x, params, num_middle)
    assert out.shape == (batch, output_dim)
    max_err = float(jnp.max(jnp.abs(out - ref)))
    assert jnp.allclose(out, ref, atol=2e-4, rtol=2e-4), \
        f"mismatch vs reference (max abs err {max_err})"

    print("KERNEL_OK")
</pallas_src>

<mosaic_0001>
module attributes {stable_mosaic.version = 11 : i64} {
  func.func @_stats_kernel(%arg0: i32, %arg1: memref<128x128xf32, #tpu.memory_space<vmem>>, %arg2: memref<128x128xf32, #tpu.memory_space<vmem>>, %arg3: memref<1x128xf32, #tpu.memory_space<vmem>>, %arg4: memref<128x128xf32, #tpu.memory_space<vmem>>, %arg5: memref<1x8x128xf32, #tpu.memory_space<vmem>>) attributes {dimension_semantics = [#tpu.dimension_semantics<parallel>], iteration_bounds = array<i64: 2>, scalar_prefetch = 0 : i64, scratch_operands = 0 : i64, tpu.core_type = #tpu.core_type<tc>, window_params = [{transform_indices = @transform_0, window_bounds = array<i64: 128, 128>}, {pipeline_mode = #tpu.pipeline_mode<synchronous>, transform_indices = @transform_1, window_bounds = array<i64: 128, 128>}, {pipeline_mode = #tpu.pipeline_mode<synchronous>, transform_indices = @transform_2, window_bounds = array<i64: 1, 128>}, {transform_indices = @transform_3, window_bounds = array<i64: 128, 128>}, {transform_indices = @transform_4, window_bounds = array<i64: 1, 8, 128>}]} {
    %c0 = arith.constant 0 : index
    %c0_0 = arith.constant 0 : index
    %0 = vector.load %arg1[%c0, %c0_0] : memref<128x128xf32, #tpu.memory_space<vmem>>, vector<128x128xf32>
    %c0_1 = arith.constant 0 : index
    %c0_2 = arith.constant 0 : index
    %1 = vector.load %arg2[%c0_1, %c0_2] : memref<128x128xf32, #tpu.memory_space<vmem>>, vector<128x128xf32>
    %cst = arith.constant dense<0.000000e+00> : vector<128x128xf32>
    %2 = tpu.matmul %0, %1, %cst {dimension_numbers = #tpu.dot_dimension_numbers<[1], [0], [0], [1], [0, 0, 1, 1], [], []>} : vector<128x128xf32>, vector<128x128xf32>, vector<128x128xf32> -> vector<128x128xf32>
    %c0_3 = arith.constant 0 : index
    %c0_4 = arith.constant 0 : index
    %3 = vector.load %arg3[%c0_3, %c0_4] : memref<1x128xf32, #tpu.memory_space<vmem>>, vector<1x128xf32>
    %4 = vector.broadcast %3 : vector<1x128xf32> to vector<128x128xf32>
    %5 = arith.addf %2, %4 : vector<128x128xf32>
    %c0_5 = arith.constant 0 : index
    %c0_6 = arith.constant 0 : index
    %6 = vector.load %arg4[%c0_5, %c0_6] : memref<128x128xf32, #tpu.memory_space<vmem>>, vector<128x128xf32>
    tpu.vector_store %arg4[%c0_5, %c0_6], %5 {strides = array<i32>} : memref<128x128xf32, #tpu.memory_space<vmem>>, vector<128x128xf32>,
    %7 = tpu.iota {dimensions = array<i32: 0>} : vector<128x128xi32>
    %c128_i32 = arith.constant 128 : i32
    %8 = arith.muli %arg0, %c128_i32 : i32
    %9 = vector.broadcast %8 : i32 to vector<128x128xi32>
    %10 = arith.addi %7, %9 : vector<128x128xi32>
    %c200_i32 = arith.constant 200 : i32
    %11 = vector.broadcast %c200_i32 : i32 to vector<128x128xi32>
    %12 = arith.cmpi slt, %10, %11 : vector<128x128xi32>
    %cst_7 = arith.constant 0.000000e+00 : f32
    %13 = vector.broadcast %cst_7 : f32 to vector<128x128xf32>
    %14 = arith.select %12, %5, %13 : vector<128x128xi1>, vector<128x128xf32>
    %cst_8 = arith.constant dense<0.000000e+00> : vector<128xf32>
    %15 = vector.multi_reduction <add>, %14, %cst_8 [0] : vector<128x128xf32> to vector<128xf32>
    %16 = vector.shape_cast %15 : vector<128xf32> to vector<1x128xf32>
    %17 = arith.mulf %14, %14 : vector<128x128xf32>
    %cst_9 = arith.constant dense<0.000000e+00> : vector<128xf32>
    %18 = vector.multi_reduction <add>, %17, %cst_9 [0] : vector<128x128xf32> to vector<128xf32>
    %19 = vector.shape_cast %18 : vector<128xf32> to vector<1x128xf32>
    %20 = tpu.iota {dimensions = array<i32: 0>} : vector<8x128xi32>
    %c0_i32 = arith.constant 0 : i32
    %21 = vector.broadcast %c0_i32 : i32 to vector<8x128xi32>
    %22 = arith.cmpi eq, %20, %21 : vector<8x128xi32>
    %cst_10 = arith.constant 0.000000e+00 : f32
    %23 = vector.shape_cast %16 : vector<1x128xf32> to vector<1x128xf32>
    %24 = vector.broadcast %23 : vector<1x128xf32> to vector<8x128xf32>
    %25 = vector.broadcast %cst_10 : f32 to vector<8x128xf32>
    %26 = arith.select %22, %24, %25 : vector<8x128xi1>, vector<8x128xf32>
    %c1_i32 = arith.constant 1 : i32
    %27 = vector.broadcast %c1_i32 : i32 to vector<8x128xi32>
    %28 = arith.cmpi eq, %20, %27 : vector<8x128xi32>
    %cst_11 = arith.constant 0.000000e+00 : f32
    %29 = vector.shape_cast %19 : vector<1x128xf32> to vector<1x128xf32>
    %30 = vector.broadcast %29 : vector<1x128xf32> to vector<8x128xf32>
    %31 = vector.broadcast %cst_11 : f32 to vector<8x128xf32>
    %32 = arith.select %28, %30, %31 : vector<8x128xi1>, vector<8x128xf32>
    %33 = arith.addf %26, %32 : vector<8x128xf32>
    %34 = vector.shape_cast %33 : vector<8x128xf32> to vector<1x8x128xf32>
    %c0_12 = arith.constant 0 : index
    %c0_13 = arith.constant 0 : index
    %c0_14 = arith.constant 0 : index
    %35 = vector.load %arg5[%c0_12, %c0_13, %c0_14] : memref<1x8x128xf32, #tpu.memory_space<vmem>>, vector<1x8x128xf32>
    tpu.vector_store %arg5[%c0_12, %c0_13, %c0_14], %34 {strides = array<i32>} : memref<1x8x128xf32, #tpu.memory_space<vmem>>, vector<1x8x128xf32>,
    return
  }
  func.func @transform_0(%arg0: i32) -> (i32, i32) {
    %c0_i32 = arith.constant 0 : i32
    %c0_i32_0 = arith.constant 0 : i32
    return %arg0, %c0_i32 : i32, i32
  }
  func.func @transform_1(%arg0: i32) -> (i32, i32) {
    %c0_i32 = arith.constant 0 : i32
    %c0_i32_0 = arith.constant 0 : i32
    %c0_i32_1 = arith.constant 0 : i32
    return %c0_i32, %c0_i32_0 : i32, i32
  }
  func.func @transform_2(%arg0: i32) -> (i32, i32) {
    %c0_i32 = arith.constant 0 : i32
    %c0_i32_0 = arith.constant 0 : i32
    %c0_i32_1 = arith.constant 0 : i32
    return %c0_i32, %c0_i32_0 : i32, i32
  }
  func.func @transform_3(%arg0: i32) -> (i32, i32) {
    %c0_i32 = arith.constant 0 : i32
    %c0_i32_0 = arith.constant 0 : i32
    return %arg0, %c0_i32 : i32, i32
  }
  func.func @transform_4(%arg0: i32) -> (i32, i32, i32) {
    %c0_i32 = arith.constant 0 : i32
    %c0_i32_0 = arith.constant 0 : i32
    %c0_i32_1 = arith.constant 0 : i32
    return %arg0, %c0_i32, %c0_i32_0 : i32, i32, i32
  }
}

module attributes {stable_mosaic.version = 11 : i64} {
  func.func @_mlp_tail_kernel(%arg0: i32, %arg1: memref<128x128xf32, #tpu.memory_space<vmem>>, %arg2: memref<1x128xf32, #tpu.memory_space<vmem>>, %arg3: memref<1x128xf32, #tpu.memory_space<vmem>>, %arg4: memref<1x128x128xf32, #tpu.memory_space<vmem>>, %arg5: memref<1x1x128xf32, #tpu.memory_space<vmem>>, %arg6: memref<128x128xf32, #tpu.memory_space<vmem>>, %arg7: memref<1x128xf32, #tpu.memory_space<vmem>>, %arg8: memref<128x128xf32, #tpu.memory_space<vmem>>) attributes {dimension_semantics = [#tpu.dimension_semantics<parallel>], iteration_bounds = array<i64: 2>, scalar_prefetch = 0 : i64, scratch_operands = 0 : i64, tpu.core_type = #tpu.core_type<tc>, window_params = [{transform_indices = @transform_0, window_bounds = array<i64: 128, 128>}, {pipeline_mode = #tpu.pipeline_mode<synchronous>, transform_indices = @transform_1, window_bounds = array<i64: 1, 128>}, {pipeline_mode = #tpu.pipeline_mode<synchronous>, transform_indices = @transform_2, window_bounds = array<i64: 1, 128>}, {pipeline_mode = #tpu.pipeline_mode<synchronous>, transform_indices = @transform_3, window_bounds = array<i64: 1, 128, 128>}, {pipeline_mode = #tpu.pipeline_mode<synchronous>, transform_indices = @transform_4, window_bounds = array<i64: 1, 1, 128>}, {pipeline_mode = #tpu.pipeline_mode<synchronous>, transform_indices = @transform_5, window_bounds = array<i64: 128, 128>}, {pipeline_mode = #tpu.pipeline_mode<synchronous>, transform_indices = @transform_6, window_bounds = array<i64: 1, 128>}, {transform_indices = @transform_7, window_bounds = array<i64: 128, 128>}]} {
    %c0 = arith.constant 0 : index
    %c0_0 = arith.constant 0 : index
    %0 = vector.load %arg1[%c0, %c0_0] : memref<128x128xf32, #tpu.memory_space<vmem>>, vector<128x128xf32>
    %c0_1 = arith.constant 0 : index
    %c0_2 = arith.constant 0 : index
    %1 = vector.load %arg2[%c0_1, %c0_2] : memref<1x128xf32, #tpu.memory_space<vmem>>, vector<1x128xf32>
    %2 = vector.broadcast %1 : vector<1x128xf32> to vector<128x128xf32>
    %3 = arith.mulf %0, %2 : vector<128x128xf32>
    %c0_3 = arith.constant 0 : index
    %c0_4 = arith.constant 0 : index
    %4 = vector.load %arg3[%c0_3, %c0_4] : memref<1x128xf32, #tpu.memory_space<vmem>>, vector<1x128xf32>
    %5 = vector.broadcast %4 : vector<1x128xf32> to vector<128x128xf32>
    %6 = arith.addf %3, %5 : vector<128x128xf32>
    %cst = arith.constant 0.000000e+00 : f32
    %7 = vector.broadcast %cst : f32 to vector<128x128xf32>
    %8 = arith.maximumf %6, %7 : vector<128x128xf32>
    %c0_i32 = arith.constant 0 : i32
    %9 = arith.index_cast %c0_i32 : i32 to index
    %c0_5 = arith.constant 0 : index
    %c0_6 = arith.constant 0 : index
    %10 = vector.load %arg4[%9, %c0_5, %c0_6] : memref<1x128x128xf32, #tpu.memory_space<vmem>>, vector<1x128x128xf32>
    %11 = vector.shape_cast %10 : vector<1x128x128xf32> to vector<128x128xf32>
    %cst_7 = arith.constant dense<0.000000e+00> : vector<128x128xf32>
    %12 = tpu.matmul %8, %11, %cst_7 {dimension_numbers = #tpu.dot_dimension_numbers<[1], [0], [0], [1], [0, 0, 1, 1], [], []>} : vector<128x128xf32>, vector<128x128xf32>, vector<128x128xf32> -> vector<128x128xf32>
    %13 = arith.index_cast %c0_i32 : i32 to index
    %c0_8 = arith.constant 0 : index
    %c0_9 = arith.constant 0 : index
    %14 = vector.load %arg5[%13, %c0_8, %c0_9] : memref<1x1x128xf32, #tpu.memory_space<vmem>>, vector<1x1x128xf32>
    %15 = vector.shape_cast %14 : vector<1x1x128xf32> to vector<1x128xf32>
    %16 = vector.broadcast %15 : vector<1x128xf32> to vector<128x128xf32>
    %17 = arith.addf %12, %16 : vector<128x128xf32>
    %cst_10 = arith.constant 0.000000e+00 : f32
    %18 = vector.broadcast %cst_10 : f32 to vector<128x128xf32>
    %19 = arith.maximumf %17, %18 : vector<128x128xf32>
    %c1_i32 = arith.constant 1 : i32
    %c0_11 = arith.constant 0 : index
    %c0_12 = arith.constant 0 : index
    %20 = vector.load %arg6[%c0_11, %c0_12] : memref<128x128xf32, #tpu.memory_space<vmem>>, vector<128x128xf32>
    %cst_13 = arith.constant dense<0.000000e+00> : vector<128x128xf32>
    %21 = tpu.matmul %19, %20, %cst_13 {dimension_numbers = #tpu.dot_dimension_numbers<[1], [0], [0], [1], [0, 0, 1, 1], [], []>} : vector<128x128xf32>, vector<128x128xf32>, vector<128x128xf32> -> vector<128x128xf32>
    %c0_14 = arith.constant 0 : index
    %c0_15 = arith.constant 0 : index
    %22 = vector.load %arg7[%c0_14, %c0_15] : memref<1x128xf32, #tpu.memory_space<vmem>>, vector<1x128xf32>
    %23 = vector.broadcast %22 : vector<1x128xf32> to vector<128x128xf32>
    %24 = arith.addf %21, %23 : vector<128x128xf32>
    %c0_16 = arith.constant 0 : index
    %c0_17 = arith.constant 0 : index
    %25 = vector.load %arg8[%c0_16, %c0_17] : memref<128x128xf32, #tpu.memory_space<vmem>>, vector<128x128xf32>
    tpu.vector_store %arg8[%c0_16, %c0_17], %24 {strides = array<i32>} : memref<128x128xf32, #tpu.memory_space<vmem>>, vector<128x128xf32>,
    return
  }
  func.func @transform_0(%arg0: i32) -> (i32, i32) {
    %c0_i32 = arith.constant 0 : i32
    %c0_i32_0 = arith.constant 0 : i32
    return %arg0, %c0_i32 : i32, i32
  }
  func.func @transform_1(%arg0: i32) -> (i32, i32) {
    %c0_i32 = arith.constant 0 : i32
    %c0_i32_0 = arith.constant 0 : i32
    %c0_i32_1 = arith.constant 0 : i32
    return %c0_i32, %c0_i32_0 : i32, i32
  }
  func.func @transform_2(%arg0: i32) -> (i32, i32) {
    %c0_i32 = arith.constant 0 : i32
    %c0_i32_0 = arith.constant 0 : i32
    %c0_i32_1 = arith.constant 0 : i32
    return %c0_i32, %c0_i32_0 : i32, i32
  }
  func.func @transform_3(%arg0: i32) -> (i32, i32, i32) {
    %c0_i32 = arith.constant 0 : i32
    %c0_i32_0 = arith.constant 0 : i32
    %c0_i32_1 = arith.constant 0 : i32
    %c0_i32_2 = arith.constant 0 : i32
    return %c0_i32, %c0_i32_0, %c0_i32_1 : i32, i32, i32
  }
  func.func @transform_4(%arg0: i32) -> (i32, i32, i32) {
    %c0_i32 = arith.constant 0 : i32
    %c0_i32_0 = arith.constant 0 : i32
    %c0_i32_1 = arith.constant 0 : i32
    %c0_i32_2 = arith.constant 0 : i32
    return %c0_i32, %c0_i32_0, %c0_i32_1 : i32, i32, i32
  }
  func.func @transform_5(%arg0: i32) -> (i32, i32) {
    %c0_i32 = arith.constant 0 : i32
    %c0_i32_0 = arith.constant 0 : i32
    %c0_i32_1 = arith.constant 0 : i32
    return %c0_i32, %c0_i32_0 : i32, i32
  }
  func.func @transform_6(%arg0: i32) -> (i32, i32) {
    %c0_i32 = arith.constant 0 : i32
    %c0_i32_0 = arith.constant 0 : i32
    %c0_i32_1 = arith.constant 0 : i32
    return %c0_i32, %c0_i32_0 : i32, i32
  }
  func.func @transform_7(%arg0: i32) -> (i32, i32) {
    %c0_i32 = arith.constant 0 : i32
    %c0_i32_0 = arith.constant 0 : i32
    return %arg0, %c0_i32 : i32, i32
  }
}

</mosaic_0001>

<bundles_post_ra>
// kernel: _lambda_.3
= control target key start
LH: loop header
LB: loop body
LE: loop exit
PB: predicated region body
PF: predicated region fallthrough
CT: control target
= control target key end

     0   :  { %s1095_s24 = smov 0   ;;  %s1299_s0 = inlined_call_operand.vmem [shape: f32[256,128], index: 0, kind: input, shape index: {}]   ;;  %s1300_s1 = inlined_call_operand.vmem [shape: f32[1,128], index: 1, kind: input, shape index: {}]   ;;  %s1301_s2 = inlined_call_operand.vmem [shape: f32[1,128], index: 2, kind: input, shape index: {}]   ;;  %s1302_s3 = inlined_call_operand.vmem [shape: f32[1,128,128], index: 3, kind: input, shape index: {}]   ;;  %s1303_s4 = inlined_call_operand.vmem [shape: f32[1,1,128], index: 4, kind: input, shape index: {}]   ;;  %s1304_s5 = inlined_call_operand.vmem [shape: f32[128,128], index: 5, kind: input, shape index: {}]   ;;  %s1305_s6 = inlined_call_operand.vmem [shape: f32[1,128], index: 6, kind: input, shape index: {}]   ;;  %s1306_s7 = inlined_call_operand.vmem [shape: f32[256,128], index: 7, kind: output, shape index: {}]  }
   0x1 LB: > { %s784_s25 = sadd.s32 4294967295, %s1053_s24   ;;  %p788_p0 = scmp.ge.s32.totalorder %s1053_s24, 1  ;;  %s1053_s24 = sphi %s1095_s24, %s17_s24  }
   0x2   : > { %p238_p1 = scmp.lt.s32.totalorder %s1053_s24, 3 }
   0x4   : > { %p239_p2 = pnand %p788_p0, %p238_p1 }
   0x5   : > { %v360_v0 = vld [vmem:[%s1302_s3] sm:$0xff] (!%p239_p2)  ;;  %v361_v1 = vld [vmem:[%s1302_s3 + $0x8] sm:$0xff] (!%p239_p2)  ;;  %v362_v2 = vld [vmem:[%s1302_s3 + $0x10] sm:$0xff] (!%p239_p2)  ;;  %s789_s9 = sshll.u32 (!%p239_p2), %s784_s25, 4 }
   0x6   : > { %242 = sbr.rel (%p239_p2) target bundleno = 502 (0x1f6), region = 48  ;;  %v975_v3 = vpack.c.bf16 (!%p239_p2), %v361_v1, %v360_v0  ;;  %v363_v4 = vld [vmem:[%s1302_s3 + $0x18] sm:$0xff] (!%p239_p2)  ;;  %p271_p3 = scmp.lt.s32.totalorder (!%p239_p2), %s789_s9, 31  ;;  %v364_v6 = vld [vmem:[%s1302_s3 + $0x20] sm:$0xff] (!%p239_p2)  ;;  %v365_v7 = vld [vmem:[%s1302_s3 + $0x28] sm:$0xff] (!%p239_p2) }
   0x7   : > { %v979_v5 = vpack.c.bf16 (!%p239_p2), %v363_v4, %v362_v2  ;;  %v983_v8 = vpack.c.bf16 (!%p239_p2), %v365_v7, %v364_v6  ;;  %v366_v9 = vld [vmem:[%s1302_s3 + $0x30] sm:$0xff] (!%p239_p2)  ;;  %v1130_v10 = vld [vmem:[%s1300_s1] ss:$0 sm:$0xff] (!%p239_p2)  ;;  %v367_v11 = vld [vmem:[%s1302_s3 + $0x38] sm:$0xff] (!%p239_p2) }
   0x8   : > { %976 = vmatprep.subr.bf16.mxu0 (!%p239_p2), %v975_v3  ;;  %v544_v12 = vld [vmem:[%s1304_s5] sm:$0xff] (!%p239_p2)  ;;  %v545_v13 = vld [vmem:[%s1304_s5 + $0x8] sm:$0xff] (!%p239_p2)  ;;  %v987_v18 = vpack.c.bf16 (!%p239_p2), %v367_v11, %v366_v9  ;;  %v370_v24 = vld [vmem:[%s1302_s3 + $0x50] sm:$0xff] (!%p239_p2) }
   0x9   : > { %978 = vmatpush3.bf16.msra.mxu0 (!%p239_p2), %v975_v3  ;;  %v1152_v15 = vld [vmem:[%s1301_s2] ss:$0 sm:$0xff] (!%p239_p2)  ;;  %v1007_v16 = vpack.c.bf16 (!%p239_p2), %v545_v13, %v544_v12  ;;  %v369_v20 = vld [vmem:[%s1302_s3 + $0x48] sm:$0xff] (!%p239_p2)  ;;  %v371_v25 = vld [vmem:[%s1302_s3 + $0x58] sm:$0xff] (!%p239_p2) }
   0xa   : > { %980 = vmatprep.subr.bf16.mxu0 (!%p239_p2), %v979_v5  ;;  %v368_v19 = vld [vmem:[%s1302_s3 + $0x40] sm:$0xff] (!%p239_p2)  ;;  %v546_v26 = vld [vmem:[%s1304_s5 + $0x10] sm:$0xff] (!%p239_p2)  ;;  %v995_v27 = vpack.c.bf16 (!%p239_p2), %v371_v25, %v370_v24  ;;  %v547_v28 = vld [vmem:[%s1304_s5 + $0x18] sm:$0xff] (!%p239_p2) }
   0xb   : > { %1008 = vmatprep.subr.bf16.mxu1 (!%p239_p2), %v1007_v16  ;;  %v991_v23 = vpack.c.bf16 (!%p239_p2), %v369_v20, %v368_v19  ;;  %v548_v29 = vld [vmem:[%s1304_s5 + $0x20] sm:$0xff] (!%p239_p2)  ;;  %v549_v30 = vld [vmem:[%s1304_s5 + $0x28] sm:$0xff] (!%p239_p2)  ;;  %v1011_v34 = vpack.c.bf16 (!%p239_p2), %v547_v28, %v546_v26  ;;  %v550_v38 = vld [vmem:[%s1304_s5 + $0x30] sm:$0xff] (!%p239_p2) }
   0xc   : > { %1010 = vmatpush3.bf16.msra.mxu1 (!%p239_p2), %v1007_v16  ;;  %v372_v31 = vld [vmem:[%s1302_s3 + $0x60] sm:$0xff] (!%p239_p2)  ;;  %v373_v32 = vld [vmem:[%s1302_s3 + $0x68] sm:$0xff] (!%p239_p2)  ;;  %v1015_v35 = vpack.c.bf16 (!%p239_p2), %v549_v30, %v548_v29  ;;  %v551_v39 = vld [vmem:[%s1304_s5 + $0x38] sm:$0xff] (!%p239_p2) }
   0xd   : > { %s1308_s9 = smov (!%p271_p3, %s789_s9), 31  ;;  %982 = vmatpush3.bf16.msra.mxu0 %v979_v5  ;;  %v999_v36 = vpack.c.bf16 %v373_v32, %v372_v31  ;;  %v374_v40 = vld [vmem:[%s1302_s3 + $0x70] sm:$0xff]  ;;  %v375_v41 = vld [vmem:[%s1302_s3 + $0x78] sm:$0xff]  ;;  %1012 = vmatprep.subr.bf16.mxu1 %v1011_v34  ;;  %v1019_v45 = vpack.c.bf16 %v551_v39, %v550_v38  ;;  %v552_v48 = vld [vmem:[%s1304_s5 + $0x40] sm:$0xff] }
   0xe   : > { %s790_s18 = sshll.u32 %s1308_s9, 3  ;;  %984 = vmatprep.subr.bf16.mxu0 %v983_v8  ;;  %v1003_v46 = vpack.c.bf16 %v375_v41, %v374_v40  ;;  %v553_v49 = vld [vmem:[%s1304_s5 + $0x48] sm:$0xff]  ;;  %v554_v57 = vld [vmem:[%s1304_s5 + $0x50] sm:$0xff]  ;;  %v555_v58 = vld [vmem:[%s1304_s5 + $0x58] sm:$0xff] }
   0xf   : > { %s1140_s26 = scalar_lea.vmem %s1299_s0, %s790_s18  ;;  %v1023_v55 = vpack.c.bf16 %v553_v49, %v552_v48  ;;  %v1027_v2 = vpack.c.bf16 %v555_v58, %v554_v57  ;;  %v556_v4 = vld [vmem:[%s1304_s5 + $0x60] sm:$0xff]  ;;  %v557_v5 = vld [vmem:[%s1304_s5 + $0x68] sm:$0xff]  ;;  %v558_v49 = vld [vmem:[%s1304_s5 + $0x70] sm:$0xff]  ;;  %s1278_s23 = scalar_lea.vmem %s1306_s7, %s790_s18 }
  0x10   : > { %v282_v14 = vld [vmem:[%s1140_s26] sm:$0xff]  ;;  %v283_v33 = vld [vmem:[%s1140_s26 + $0x8] sm:$0xff]  ;;  %v284_v37 = vld [vmem:[%s1140_s26 + $0x10] sm:$0xff]  ;;  %1014 = vmatpush3.bf16.msra.mxu1 %v1011_v34 }
  0x11   : > { %v305_v17 = vmul.f32 %v1130_v10, %v282_v14  ;;  %986 = vmatpush3.bf16.msra.mxu0 %v983_v8  ;;  %v306_v42 = vmul.f32 %v1130_v10, %v283_v33  ;;  %v307_v43 = vmul.f32 %v1130_v10, %v284_v37  ;;  %v285_v44 = vld [vmem:[%s1140_s26 + $0x18] sm:$0xff]  ;;  %1016 = vmatprep.subr.bf16.mxu1 %v1015_v35  ;;  %v286_v47 = vld [vmem:[%s1140_s26 + $0x20] sm:$0xff]  ;;  %v287_v54 = vld [vmem:[%s1140_s26 + $0x28] sm:$0xff] }
  0x12   : > { %988 = vmatprep.subr.bf16.mxu0 %v987_v18  ;;  %v308_v51 = vmul.f32 %v1130_v10, %v285_v44  ;;  %v309_v53 = vmul.f32 %v1130_v10, %v286_v47  ;;  %v288_v56 = vld [vmem:[%s1140_s26 + $0x30] sm:$0xff]  ;;  %v310_v61 = vmul.f32 %v1130_v10, %v287_v54  ;;  %v289_v1 = vld [vmem:[%s1140_s26 + $0x38] sm:$0xff]  ;;  %v290_v3 = vld [vmem:[%s1140_s26 + $0x40] sm:$0xff]  ;;  %v1031_v14 = vpack.c.bf16 %v557_v5, %v556_v4 }
  0x13   : > { %v328_v21 = vadd.f32 %v1152_v15, %v305_v17  ;;  %v329_v50 = vadd.f32 %v1152_v15, %v306_v42  ;;  %v330_v52 = vadd.f32 %v1152_v15, %v307_v43  ;;  %v311_v0 = vmul.f32 %v1130_v10, %v288_v56  ;;  %v291_v13 = vld [vmem:[%s1140_s26 + $0x48] sm:$0xff]  ;;  %v292_v16 = vld [vmem:[%s1140_s26 + $0x50] sm:$0xff]  ;;  %v294_v24 = vld [vmem:[%s1140_s26 + $0x60] sm:$0xff] }
  0x14   : > { %1018 = vmatpush3.bf16.msra.mxu1 %v1015_v35  ;;  %v331_v60 = vadd.f32 %v1152_v15, %v308_v51  ;;  %v332_v63 = vadd.f32 %v1152_v15, %v309_v53  ;;  %v333_v7 = vadd.f32 %v1152_v15, %v310_v61  ;;  %v312_v8 = vmul.f32 %v1130_v10, %v289_v1  ;;  %v295_v31 = vld [vmem:[%s1140_s26 + $0x68] sm:$0xff]  ;;  %v296_v32 = vld [vmem:[%s1140_s26 + $0x70] sm:$0xff]  ;;  %v297_v39 = vld [vmem:[%s1140_s26 + $0x78] sm:$0xff] }
  0x15   : > { %v344_v22 = vmax.f32 %v328_v21, 0.0  ;;  %990 = vmatpush3.bf16.msra.mxu0 %v987_v18  ;;  %1020 = vmatprep.subr.bf16.mxu1 %v1019_v45  ;;  %v345_v59 = vmax.f32 %v329_v50, 0.0  ;;  %v346_v62 = vmax.f32 %v330_v52, 0.0  ;;  %v334_v11 = vadd.f32 %v1152_v15, %v311_v0 }
  0x16   : > { %992 = vmatprep.subr.bf16.mxu0 %v991_v23  ;;  %v347_v6 = vmax.f32 %v331_v60, 0.0  ;;  %v348_v9 = vmax.f32 %v332_v63, 0.0  ;;  %v313_v12 = vmul.f32 %v1130_v10, %v290_v3  ;;  %v349_v17 = vmax.f32 %v333_v7, 0.0 }
  0x17   : > { %895 = vmatprep.mubr.f32.mxu0 %v344_v22  ;;  %v335_v18 = vadd.f32 %v1152_v15, %v312_v8  ;;  %v314_v19 = vmul.f32 %v1130_v10, %v291_v13  ;;  %v350_v20 = vmax.f32 %v334_v11, 0.0  ;;  %v315_v22 = vmul.f32 %v1130_v10, %v292_v16 }
  0x18   : > { %1022 = vmatpush3.bf16.msra.mxu1 %v1019_v45  ;;  %v336_v21 = vadd.f32 %v1152_v15, %v313_v12  ;;  %v317_v30 = vmul.f32 %v1130_v10, %v294_v24  ;;  %v318_v35 = vmul.f32 %v1130_v10, %v295_v31  ;;  %v319_v38 = vmul.f32 %v1130_v10, %v296_v32 }
  0x19   : > { %994 = vmatpush3.bf16.msra.mxu0 %v991_v23  ;;  %1024 = vmatprep.subr.bf16.mxu1 %v1023_v55  ;;  %v293_v23 = vld [vmem:[%s1140_s26 + $0x58] sm:$0xff]  ;;  %v351_v25 = vmax.f32 %v335_v18, 0.0  ;;  %v337_v26 = vadd.f32 %v1152_v15, %v314_v19  ;;  %v338_v29 = vadd.f32 %v1152_v15, %v315_v22  ;;  %v320_v42 = vmul.f32 %v1130_v10, %v297_v39 }
  0x1a   : > { %996 = vmatprep.subr.bf16.mxu0 %v995_v27  ;;  %v352_v28 = vmax.f32 %v336_v21, 0.0  ;;  %v340_v37 = vadd.f32 %v1152_v15, %v317_v30  ;;  %v341_v41 = vadd.f32 %v1152_v15, %v318_v35  ;;  %v342_v44 = vadd.f32 %v1152_v15, %v319_v38 }
  0x1b   : > { %v353_v33 = vmax.f32 %v337_v26, 0.0 }
  0x1c   : > { %1026 = vmatpush3.bf16.msra.mxu1 %v1023_v55  ;;  %v356_v43 = vmax.f32 %v340_v37, 0.0  ;;  %v357_v45 = vmax.f32 %v341_v41, 0.0  ;;  %v358_v47 = vmax.f32 %v342_v44, 0.0  ;;  %v796_v37 = vld [vmem:[%s1305_s6] ss:$0 sm:$0xff] }
  0x1d   : > { %998 = vmatpush3.bf16.msra.mxu0 %v995_v27  ;;  %1028 = vmatprep.subr.bf16.mxu1 %v1027_v2  ;;  %v316_v27 = vmul.f32 %v1130_v10, %v293_v23  ;;  %v559_v10 = vld [vmem:[%s1304_s5 + $0x78] sm:$0xff] }
  0x1e   : > { %1000 = vmatprep.subr.bf16.mxu0 %v999_v36  ;;  %v1035_v50 = vpack.c.bf16 %v559_v10, %v558_v49 }
  0x1f   : > { %v339_v34 = vadd.f32 %v1152_v15, %v316_v27 }
  0x20   : > { %1030 = vmatpush3.bf16.msra.mxu1 %v1027_v2 }
  0x21   : > { %1002 = vmatpush3.bf16.msra.mxu0 %v999_v36  ;;  %1032 = vmatprep.subr.bf16.mxu1 %v1031_v14  ;;  %v354_v36 = vmax.f32 %v338_v29, 0.0  ;;  %v355_v40 = vmax.f32 %v339_v34, 0.0 }
  0x22   : > { %1004 = vmatprep.subr.bf16.mxu0 %v1003_v46 }
  0x24   : > { %1034 = vmatpush3.bf16.msra.mxu1 %v1031_v14 }
  0x25   : > { %1006 = vmatpush3.bf16.msra.mxu0 %v1003_v46  ;;  %v343_v46 = vadd.f32 %v1152_v15, %v320_v42  ;;  %1036 = vmatprep.subr.bf16.mxu1 %v1035_v50  ;;  %v795_v15 = vld [vmem:[%s1303_s4] ss:$0 sm:$0xff] }
  0x27   : > { %v359_v48 = vmax.f32 %v343_v46, 0.0 }
  0x28   : > { %896 = vmatmul.mubr.f32.vlgmr.msra.gmra.mrb[0].mxu0 %v345_v59  ;;  %1038 = vmatpush3.bf16.msra.mxu1 %v1035_v50 }
  0x29   : > { %898 = vmatprep.mubr.f32.mxu0 %v346_v62 }
  0x2c   : > { %899 = vmatmul.mubr.f32.gmra.mrb[2].mxu0 %v347_v6 }
  0x2d   : > { %901 = vmatprep.mubr.f32.mxu0 %v348_v9 }
  0x30   : > { %902 = vmatmul.mubr.f32.gmra.mrb[4].mxu0 %v349_v17 }
  0x31   : > { %904 = vmatprep.mubr.f32.mxu0 %v350_v20 }
  0x34   : > { %905 = vmatmul.mubr.f32.gmra.mrb[6].mxu0 %v351_v25 }
  0x35   : > { %907 = vmatprep.mubr.f32.mxu0 %v352_v28 }
  0x38   : > { %908 = vmatmul.mubr.f32.gmra.mrb[8].mxu0 %v353_v33 }
  0x39   : > { %910 = vmatprep.mubr.f32.mxu0 %v354_v36 }
  0x3c   : > { %911 = vmatmul.mubr.f32.gmra.mrb[10].mxu0 %v355_v40 }
  0x3d   : > { %913 = vmatprep.mubr.f32.mxu0 %v356_v43 }
  0x40   : > { %914 = vmatmul.mubr.f32.gmra.mrb[12].mxu0 %v357_v45 }
  0x41   : > { %916 = vmatprep.mubr.f32.mxu0 %v358_v47 }
  0x44   : > { %917 = vmatmul.mubr.f32.gmra.mrb[14].mxu0 %v359_v48 }
  0xfb   : > { %v897_v51 = vpop.f32.mrb[0].mxu0 }
  0xfc   : > { %v455_v52 = vadd.f32 %v897_v51, %v795_v15  ;;  %v449_v53 = vpop.f32.mrb[1].mxu0 }
  0xfd   : > { %v450_v54 = vadd.f32 %v795_v15, %v449_v53 }
  0xfe   : > { %v529_v57 = vmax.f32 %v455_v52, 0.0 }
  0xff   : > { %v900_v55 = vpop.f32.mrb[2].mxu0  ;;  %v528_v56 = vmax.f32 %v450_v54, 0.0 }
 0x100   : > { %v465_v58 = vadd.f32 %v900_v55, %v795_v15  ;;  %v459_v59 = vpop.f32.mrb[3].mxu0 }
 0x101   : > { %v460_v60 = vadd.f32 %v795_v15, %v459_v59  ;;  %951 = vmatprep.mubr.f32.mxu1 %v528_v56 }
 0x102   : > { %952 = vmatmul.mubr.f32.vlgmr.msra.gmra.mrb[0].mxu1 %v529_v57  ;;  %v531_v63 = vmax.f32 %v465_v58, 0.0 }
 0x103   : > { %v530_v61 = vmax.f32 %v460_v60, 0.0  ;;  %v903_v62 = vpop.f32.mrb[4].mxu0 }
 0x104   : > { %v475_v0 = vadd.f32 %v903_v62, %v795_v15  ;;  %v469_v1 = vpop.f32.mrb[5].mxu0 }
 0x105   : > { %v470_v2 = vadd.f32 %v795_v15, %v469_v1  ;;  %954 = vmatprep.mubr.f32.mxu1 %v530_v61 }
 0x106   : > { %955 = vmatmul.mubr.f32.gmra.mrb[2].mxu1 %v531_v63  ;;  %v533_v5 = vmax.f32 %v475_v0, 0.0 }
 0x107   : > { %v532_v3 = vmax.f32 %v470_v2, 0.0  ;;  %v906_v4 = vpop.f32.mrb[6].mxu0 }
 0x108   : > { %v485_v6 = vadd.f32 %v906_v4, %v795_v15  ;;  %v479_v7 = vpop.f32.mrb[7].mxu0 }
 0x109   : > { %v480_v8 = vadd.f32 %v795_v15, %v479_v7  ;;  %957 = vmatprep.mubr.f32.mxu1 %v532_v3 }
 0x10a   : > { %958 = vmatmul.mubr.f32.gmra.mrb[4].mxu1 %v533_v5  ;;  %v535_v12 = vmax.f32 %v485_v6, 0.0 }
 0x10b   : > { %v534_v9 = vmax.f32 %v480_v8, 0.0  ;;  %v909_v11 = vpop.f32.mrb[8].mxu0 }
 0x10c   : > { %v495_v13 = vadd.f32 %v909_v11, %v795_v15  ;;  %v489_v14 = vpop.f32.mrb[9].mxu0 }
 0x10d   : > { %v490_v16 = vadd.f32 %v795_v15, %v489_v14  ;;  %960 = vmatprep.mubr.f32.mxu1 %v534_v9 }
 0x10e   : > { %961 = vmatmul.mubr.f32.gmra.mrb[6].mxu1 %v535_v12  ;;  %v537_v19 = vmax.f32 %v495_v13, 0.0 }
 0x10f   : > { %v536_v17 = vmax.f32 %v490_v16, 0.0  ;;  %v912_v18 = vpop.f32.mrb[10].mxu0 }
 0x110   : > { %v505_v20 = vadd.f32 %v912_v18, %v795_v15  ;;  %v499_v21 = vpop.f32.mrb[11].mxu0 }
 0x111   : > { %v500_v22 = vadd.f32 %v795_v15, %v499_v21  ;;  %963 = vmatprep.mubr.f32.mxu1 %v536_v17 }
 0x112   : > { %964 = vmatmul.mubr.f32.gmra.mrb[8].mxu1 %v537_v19  ;;  %v539_v25 = vmax.f32 %v505_v20, 0.0 }
 0x113   : > { %v538_v23 = vmax.f32 %v500_v22, 0.0  ;;  %v915_v24 = vpop.f32.mrb[12].mxu0 }
 0x114   : > { %v515_v26 = vadd.f32 %v915_v24, %v795_v15  ;;  %v509_v27 = vpop.f32.mrb[13].mxu0 }
 0x115   : > { %v510_v28 = vadd.f32 %v795_v15, %v509_v27  ;;  %966 = vmatprep.mubr.f32.mxu1 %v538_v23 }
 0x116   : > { %967 = vmatmul.mubr.f32.gmra.mrb[10].mxu1 %v539_v25  ;;  %v541_v31 = vmax.f32 %v515_v26, 0.0 }
 0x117   : > { %v540_v29 = vmax.f32 %v510_v28, 0.0  ;;  %v918_v30 = vpop.f32.mrb[14].mxu0 }
 0x118   : > { %v525_v32 = vadd.f32 %v918_v30, %v795_v15  ;;  %v519_v33 = vpop.f32.mrb[15].mxu0 }
 0x119   : > { %v520_v34 = vadd.f32 %v795_v15, %v519_v33  ;;  %969 = vmatprep.mubr.f32.mxu1 %v540_v29 }
 0x11a   : > { %970 = vmatmul.mubr.f32.gmra.mrb[12].mxu1 %v541_v31  ;;  %v543_v36 = vmax.f32 %v525_v32, 0.0 }
 0x11b   : > { %v542_v35 = vmax.f32 %v520_v34, 0.0 }
 0x11d   : > { %972 = vmatprep.mubr.f32.mxu1 %v542_v35 }
 0x11e   : > { %973 = vmatmul.mubr.f32.gmra.mrb[14].mxu1 %v543_v36 }
 0x1d5   : > { %v953_v38 = vpop.f32.mrb[0].mxu1 }
 0x1d6   : > { %v639_v39 = vadd.f32 %v953_v38, %v796_v37  ;;  %v633_v40 = vpop.f32.mrb[1].mxu1 }
 0x1d7   : > { %v634_v41 = vadd.f32 %v796_v37, %v633_v40 }
 0x1d8   : > { %713 = vst [vmem:[%s1278_s23 + $0x8] sm:$0xff] %v639_v39 }
 0x1d9   : > { %712 = vst [vmem:[%s1278_s23] sm:$0xff] %v634_v41  ;;  %v956_v42 = vpop.f32.mrb[2].mxu1 }
 0x1da   : > { %v649_v43 = vadd.f32 %v956_v42, %v796_v37  ;;  %v643_v44 = vpop.f32.mrb[3].mxu1 }
 0x1db   : > { %v644_v45 = vadd.f32 %v796_v37, %v643_v44 }
 0x1dc   : > { %715 = vst [vmem:[%s1278_s23 + $0x18] sm:$0xff] %v649_v43 }
 0x1dd   : > { %714 = vst [vmem:[%s1278_s23 + $0x10] sm:$0xff] %v644_v45  ;;  %v959_v46 = vpop.f32.mrb[4].mxu1 }
 0x1de   : > { %v659_v47 = vadd.f32 %v959_v46, %v796_v37  ;;  %v653_v48 = vpop.f32.mrb[5].mxu1 }
 0x1df   : > { %v654_v49 = vadd.f32 %v796_v37, %v653_v48 }
 0x1e0   : > { %717 = vst [vmem:[%s1278_s23 + $0x28] sm:$0xff] %v659_v47 }
 0x1e1   : > { %716 = vst [vmem:[%s1278_s23 + $0x20] sm:$0xff] %v654_v49  ;;  %v962_v10 = vpop.f32.mrb[6].mxu1 }
 0x1e2   : > { %v669_v50 = vadd.f32 %v962_v10, %v796_v37  ;;  %v663_v15 = vpop.f32.mrb[7].mxu1 }
 0x1e3   : > { %v664_v51 = vadd.f32 %v796_v37, %v663_v15 }
 0x1e4   : > { %719 = vst [vmem:[%s1278_s23 + $0x38] sm:$0xff] %v669_v50 }
 0x1e5   : > { %718 = vst [vmem:[%s1278_s23 + $0x30] sm:$0xff] %v664_v51  ;;  %v965_v52 = vpop.f32.mrb[8].mxu1 }
 0x1e6   : > { %v679_v53 = vadd.f32 %v965_v52, %v796_v37  ;;  %v673_v54 = vpop.f32.mrb[9].mxu1 }
 0x1e7   : > { %v674_v55 = vadd.f32 %v796_v37, %v673_v54 }
 0x1e8   : > { %721 = vst [vmem:[%s1278_s23 + $0x48] sm:$0xff] %v679_v53 }
 0x1e9   : > { %720 = vst [vmem:[%s1278_s23 + $0x40] sm:$0xff] %v674_v55  ;;  %v968_v56 = vpop.f32.mrb[10].mxu1 }
 0x1ea   : > { %v689_v57 = vadd.f32 %v968_v56, %v796_v37  ;;  %v683_v58 = vpop.f32.mrb[11].mxu1 }
 0x1eb   : > { %v684_v59 = vadd.f32 %v796_v37, %v683_v58 }
 0x1ec   : > { %723 = vst [vmem:[%s1278_s23 + $0x58] sm:$0xff] %v689_v57 }
 0x1ed   : > { %722 = vst [vmem:[%s1278_s23 + $0x50] sm:$0xff] %v684_v59  ;;  %v971_v60 = vpop.f32.mrb[12].mxu1 }
 0x1ee   : > { %v699_v61 = vadd.f32 %v971_v60, %v796_v37  ;;  %v693_v62 = vpop.f32.mrb[13].mxu1 }
 0x1ef   : > { %v694_v63 = vadd.f32 %v796_v37, %v693_v62 }
 0x1f0   : > { %725 = vst [vmem:[%s1278_s23 + $0x68] sm:$0xff] %v699_v61 }
 0x1f1   : > { %724 = vst [vmem:[%s1278_s23 + $0x60] sm:$0xff] %v694_v63  ;;  %v974_v0 = vpop.f32.mrb[14].mxu1 }
 0x1f2   : > { %v709_v1 = vadd.f32 %v974_v0, %v796_v37  ;;  %v703_v2 = vpop.f32.mrb[15].mxu1 }
 0x1f3   : > { %v704_v3 = vadd.f32 %v796_v37, %v703_v2 }
 0x1f4   : > { %727 = vst [vmem:[%s1278_s23 + $0x78] sm:$0xff] %v709_v1 }
 0x1f5   : > { %726 = vst [vmem:[%s1278_s23 + $0x70] sm:$0xff] %v704_v3 }
 0x1f6 PF: > { %s17_s24 = sadd.s32 1, %s1053_s24  }
 0x1f7   : > { %p14_p4 = scmp.ge.s32.totalorder %s17_s24, 4  }
 0x1f9   :  { %16 = sbr.rel (!%p14_p4) target bundleno = 1 (0x1), region = 78 }

// kernel: _lambda_.2
= control target key start
LH: loop header
LB: loop body
LE: loop exit
PB: predicated region body
PF: predicated region fallthrough
CT: control target
= control target key end

     0   :  { %s821_s15 = smov 0   ;;  %s1044_s0 = inlined_call_operand.vmem [shape: f32[256,128], index: 0, kind: input, shape index: {}]   ;;  %s1045_s1 = inlined_call_operand.vmem [shape: f32[128,128], index: 1, kind: input, shape index: {}]   ;;  %s1046_s2 = inlined_call_operand.vmem [shape: f32[1,128], index: 2, kind: input, shape index: {}]   ;;  %s1047_s3 = inlined_call_operand.vmem [shape: f32[256,128], index: 3, kind: output, shape index: {0}]   ;;  %s1048_s4 = inlined_call_operand.vmem [shape: f32[2,8,128], index: 4, kind: output, shape index: {1}]  }
   0x1 LB: > { %s827_s16 = sadd.s32 4294967295, %s794_s15   ;;  %p634_p0 = scmp.ge.s32.totalorder %s794_s15, 1  ;;  %s794_s15 = sphi %s821_s15, %s15_s15  }
   0x2   : > { %p166_p1 = scmp.lt.s32.totalorder %s794_s15, 3 }
   0x4   : > { %p167_p2 = pnand %p634_p0, %p166_p1 }
   0x5   : > { %v228_v0 = vld [vmem:[%s1045_s1] sm:$0xff] (!%p167_p2)  ;;  %v229_v1 = vld [vmem:[%s1045_s1 + $0x8] sm:$0xff] (!%p167_p2)  ;;  %v230_v2 = vld [vmem:[%s1045_s1 + $0x10] sm:$0xff] (!%p167_p2)  ;;  %s635_s23 = sshll.u32 (!%p167_p2), %s827_s16, 4  ;;  %v412_v40 = vlaneseq (!%p167_p2)  ;;  %s641_s6 = sshll.u32 (!%p167_p2), %s827_s16, 7 }
   0x6   : > { %170 = sbr.rel (%p167_p2) target bundleno = 306 (0x132), region = 32  ;;  %v732_v3 = vpack.c.bf16 (!%p167_p2), %v229_v1, %v228_v0  ;;  %v231_v4 = vld [vmem:[%s1045_s1 + $0x18] sm:$0xff] (!%p167_p2)  ;;  %p197_p3 = scmp.lt.s32.totalorder (!%p167_p2), %s635_s23, 31  ;;  %v232_v6 = vld [vmem:[%s1045_s1 + $0x20] sm:$0xff] (!%p167_p2)  ;;  %v233_v7 = vld [vmem:[%s1045_s1 + $0x28] sm:$0xff] (!%p167_p2)  ;;  %v910_v43 = vstv (!%p167_p2), %s641_s6 }
   0x7   : > { %v736_v5 = vpack.c.bf16 (!%p167_p2), %v231_v4, %v230_v2  ;;  %v740_v8 = vpack.c.bf16 (!%p167_p2), %v233_v7, %v232_v6  ;;  %v234_v9 = vld [vmem:[%s1045_s1 + $0x30] sm:$0xff] (!%p167_p2)  ;;  %v235_v10 = vld [vmem:[%s1045_s1 + $0x38] sm:$0xff] (!%p167_p2)  ;;  %v236_v14 = vld [vmem:[%s1045_s1 + $0x40] sm:$0xff] (!%p167_p2)  ;;  %v906_v41 = vshrl.u32 (!%p167_p2), %v412_v40, 7  ;;  %p208_p4 = scmp.lt.s32.totalorder (!%p167_p2), %s827_s16, 1 }
   0x8   : > { %733 = vmatprep.subr.bf16.mxu0 (!%p167_p2), %v732_v3  ;;  %764 = vmatprep.subr.bf16.mxu1 (!%p167_p2), %v732_v3  ;;  %v744_v12 = vpack.c.bf16 (!%p167_p2), %v235_v10, %v234_v9  ;;  %v237_v15 = vld [vmem:[%s1045_s1 + $0x48] sm:$0xff] (!%p167_p2)  ;;  %v238_v17 = vld [vmem:[%s1045_s1 + $0x50] sm:$0xff] (!%p167_p2)  ;;  %v239_v18 = vld [vmem:[%s1045_s1 + $0x58] sm:$0xff] (!%p167_p2) }
   0x9   : > { %735 = vmatpush3.bf16.msra.mxu0 (!%p167_p2), %v732_v3  ;;  %772 = vmatpush3.bf16.msra.mxu1 (!%p167_p2), %v732_v3  ;;  %v748_v16 = vpack.c.bf16 (!%p167_p2), %v237_v15, %v236_v14  ;;  %v752_v19 = vpack.c.bf16 (!%p167_p2), %v239_v18, %v238_v17  ;;  %v240_v20 = vld [vmem:[%s1045_s1 + $0x60] sm:$0xff] (!%p167_p2)  ;;  %v241_v21 = vld [vmem:[%s1045_s1 + $0x68] sm:$0xff] (!%p167_p2)  ;;  %v242_v23 = vld [vmem:[%s1045_s1 + $0x70] sm:$0xff] (!%p167_p2)  ;;  %v414_v42 = vadd.s32 (!%p167_p2), 8, %v906_v41  ;;  %v416_v44 = vadd.s32 (!%p167_p2), 24, %v906_v41 }
   0xa   : > { %737 = vmatprep.subr.bf16.mxu0 (!%p167_p2), %v736_v5  ;;  %765 = vmatprep.subr.bf16.mxu1 (!%p167_p2), %v736_v5  ;;  %v756_v22 = vpack.c.bf16 (!%p167_p2), %v241_v21, %v240_v20  ;;  %v243_v24 = vld [vmem:[%s1045_s1 + $0x78] sm:$0xff] (!%p167_p2)  ;;  %v415_v45 = vadd.s32 (!%p167_p2), 16, %v906_v41  ;;  %v418_v47 = vadd.s32 (!%p167_p2), 40, %v906_v41  ;;  %v431_v48 = vadd.s32 (!%p167_p2), %v910_v43, %v906_v41  ;;  %v921_v49 = vld [vmem:[%s1046_s2] ss:$0 sm:$0xff] (!%p167_p2) }
   0xb   : > { %v760_v25 = vpack.c.bf16 (!%p167_p2), %v243_v24, %v242_v23  ;;  %v432_v46 = vadd.s32 (!%p167_p2), %v910_v43, %v414_v42  ;;  %v434_v50 = vadd.s32 (!%p167_p2), %v910_v43, %v416_v44  ;;  %v417_v52 = vadd.s32 (!%p167_p2), 32, %v906_v41 }
   0xc   : > { %v433_v51 = vadd.s32 (!%p167_p2), %v910_v43, %v415_v45  ;;  %v420_v53 = vadd.s32 (!%p167_p2), 56, %v906_v41  ;;  %v935_v55 = vadd.s32 (!%p167_p2), %v910_v43, %v418_v47  ;;  %v419_v56 = vadd.s32 (!%p167_p2), 48, %v906_v41 }
   0xd   : > { %s1050_s23 = smov (!%p197_p3, %s635_s23), 31  ;;  %739 = vmatpush3.bf16.msra.mxu0 %v736_v5  ;;  %773 = vmatpush3.bf16.msra.mxu1 %v736_v5  ;;  %vm448_vm0 = vcmp.lt.s32.totalorder %v432_v46, 200  ;;  %vm447_vm1 = vcmp.lt.s32.totalorder %v431_v48, 200  ;;  %v422_v61 = vadd.s32 72, %v906_v41  ;;  %vm450_vm2 = vcmp.lt.s32.totalorder %v434_v50, 200  ;;  %s1052_s16 = smov (!%p208_p4, %s827_s16), 1 }
   0xe   : > { %s636_s30 = sshll.u32 %s1050_s23, 3  ;;  %741 = vmatprep.subr.bf16.mxu0 %v740_v8  ;;  %766 = vmatprep.subr.bf16.mxu1 %v740_v8  ;;  %vm449_vm3 = vcmp.lt.s32.totalorder %v433_v51, 200  ;;  %v435_v2 = vadd.s32 %v910_v43, %v417_v52  ;;  %v950_v3 = vadd.s32 %v910_v43, %v420_v53  ;;  %v421_v4 = vadd.s32 64, %v906_v41  ;;  %s639_s23 = sshll.u32 %s1052_s16, 3 }
   0xf   : > { %s864_s11 = scalar_lea.vmem %s1044_s0, %s636_s30  ;;  %vm452_vm4 = vcmp.lt.s32.totalorder %v935_v55, 200  ;;  %v965_v14 = vadd.s32 %v910_v43, %v422_v61  ;;  %v425_v45 = vadd.s32 96, %v906_v41  ;;  %v426_v55 = vadd.s32 104, %v906_v41  ;;  %s211_s13 = scalar_lea.vmem %s1048_s4, %s639_s23 }
  0x10   : > { %v212_v11 = vld [vmem:[%s864_s11] sm:$0xff]  ;;  %v213_v26 = vld [vmem:[%s864_s11 + $0x8] sm:$0xff]  ;;  %v214_v28 = vld [vmem:[%s864_s11 + $0x10] sm:$0xff]  ;;  %vm451_vm5 = vcmp.lt.s32.totalorder %v435_v2, 200  ;;  %vm454_vm6 = vcmp.lt.s32.totalorder %v950_v3, 200  ;;  %v439_v21 = vadd.s32 %v910_v43, %v421_v4 }
  0x11   : > { %v220_v13 = vld [vmem:[%s864_s11 + $0x40] sm:$0xff]  ;;  %708 = vmatprep.mubr.f32.mxu0 %v212_v11  ;;  %743 = vmatpush3.bf16.msra.mxu0 %v740_v8  ;;  %v221_v27 = vld [vmem:[%s864_s11 + $0x48] sm:$0xff]  ;;  %v222_v29 = vld [vmem:[%s864_s11 + $0x50] sm:$0xff]  ;;  %vm456_vm8 = vcmp.lt.s32.totalorder %v965_v14, 200  ;;  %v443_v2 = vadd.s32 %v910_v43, %v425_v45 }
  0x12   : > { %720 = vmatprep.mubr.f32.mxu1 %v220_v13  ;;  %774 = vmatpush3.bf16.msra.mxu1 %v740_v8  ;;  %v215_v30 = vld [vmem:[%s864_s11 + $0x18] sm:$0xff]  ;;  %v216_v32 = vld [vmem:[%s864_s11 + $0x20] sm:$0xff]  ;;  %v217_v34 = vld [vmem:[%s864_s11 + $0x28] sm:$0xff]  ;;  %v959_v8 = vadd.s32 %v910_v43, %v419_v56  ;;  %vm455_vm9 = vcmp.lt.s32.totalorder %v439_v21, 200 }
  0x13   : > { %745 = vmatprep.subr.bf16.mxu0 %v744_v12  ;;  %767 = vmatprep.subr.bf16.mxu1 %v744_v12  ;;  %v223_v31 = vld [vmem:[%s864_s11 + $0x58] sm:$0xff]  ;;  %v224_v33 = vld [vmem:[%s864_s11 + $0x60] sm:$0xff]  ;;  %v225_v35 = vld [vmem:[%s864_s11 + $0x68] sm:$0xff]  ;;  %vm459_vm12 = vcmp.lt.s32.totalorder %v443_v2, 200 }
  0x14   : > { %v218_v36 = vld [vmem:[%s864_s11 + $0x30] sm:$0xff]  ;;  %v219_v38 = vld [vmem:[%s864_s11 + $0x38] sm:$0xff]  ;;  %vm453_vm7 = vcmp.lt.s32.totalorder %v959_v8, 200 }
  0x15   : > { %747 = vmatpush3.bf16.msra.mxu0 %v744_v12  ;;  %v226_v37 = vld [vmem:[%s864_s11 + $0x70] sm:$0xff]  ;;  %v227_v39 = vld [vmem:[%s864_s11 + $0x78] sm:$0xff]  ;;  %s932_s11 = scalar_lea.vmem %s1047_s3, %s636_s30 }
  0x16   : > { %775 = vmatpush3.bf16.msra.mxu1 %v744_v12  ;;  %749 = vmatprep.subr.bf16.mxu0 %v748_v16 }
  0x17   : > { %768 = vmatprep.subr.bf16.mxu1 %v748_v16 }
  0x19   : > { %751 = vmatpush3.bf16.msra.mxu0 %v748_v16 }
  0x1a   : > { %776 = vmatpush3.bf16.msra.mxu1 %v748_v16  ;;  %753 = vmatprep.subr.bf16.mxu0 %v752_v19 }
  0x1b   : > { %769 = vmatprep.subr.bf16.mxu1 %v752_v19 }
  0x1d   : > { %755 = vmatpush3.bf16.msra.mxu0 %v752_v19 }
  0x1e   : > { %777 = vmatpush3.bf16.msra.mxu1 %v752_v19  ;;  %757 = vmatprep.subr.bf16.mxu0 %v756_v22  ;;  %v423_v19 = vadd.s32 80, %v906_v41 }
  0x1f   : > { %770 = vmatprep.subr.bf16.mxu1 %v756_v22 }
  0x21   : > { %759 = vmatpush3.bf16.msra.mxu0 %v756_v22 }
  0x22   : > { %778 = vmatpush3.bf16.msra.mxu1 %v756_v22  ;;  %761 = vmatprep.subr.bf16.mxu0 %v760_v25 }
  0x23   : > { %771 = vmatprep.subr.bf16.mxu1 %v760_v25 }
  0x25   : > { %763 = vmatpush3.bf16.msra.mxu0 %v760_v25 }
  0x26   : > { %779 = vmatpush3.bf16.msra.mxu1 %v760_v25  ;;  %v424_v25 = vadd.s32 88, %v906_v41 }
  0x28   : > { %709 = vmatmul.mubr.f32.vlgmr.msra.gmra.mrb[0].mxu0 %v213_v26  ;;  %v442_v44 = vadd.s32 %v910_v43, %v424_v25 }
  0x29   : > { %721 = vmatmul.mubr.f32.vlgmr.msra.gmra.mrb[0].mxu1 %v221_v27  ;;  %711 = vmatprep.mubr.f32.mxu0 %v214_v28 }
  0x2a   : > { %723 = vmatprep.mubr.f32.mxu1 %v222_v29  ;;  %vm458_vm11 = vcmp.lt.s32.totalorder %v442_v44, 200 }
  0x2c   : > { %712 = vmatmul.mubr.f32.gmra.mrb[2].mxu0 %v215_v30 }
  0x2d   : > { %724 = vmatmul.mubr.f32.gmra.mrb[2].mxu1 %v223_v31  ;;  %714 = vmatprep.mubr.f32.mxu0 %v216_v32 }
  0x2e   : > { %726 = vmatprep.mubr.f32.mxu1 %v224_v33  ;;  %v441_v33 = vadd.s32 %v910_v43, %v423_v19 }
  0x30   : > { %715 = vmatmul.mubr.f32.gmra.mrb[4].mxu0 %v217_v34  ;;  %vm457_vm10 = vcmp.lt.s32.totalorder %v441_v33, 200 }
  0x31   : > { %727 = vmatmul.mubr.f32.gmra.mrb[4].mxu1 %v225_v35  ;;  %717 = vmatprep.mubr.f32.mxu0 %v218_v36 }
  0x32   : > { %729 = vmatprep.mubr.f32.mxu1 %v226_v37 }
  0x34   : > { %718 = vmatmul.mubr.f32.gmra.mrb[6].mxu0 %v219_v38 }
  0x35   : > { %730 = vmatmul.mubr.f32.gmra.mrb[6].mxu1 %v227_v39 }
  0xfb   : > { %v710_v54 = vpop.f32.mrb[0].mxu0 }
  0xfc   : > { %v722_v57 = vpop.f32.mrb[0].mxu1  ;;  %v323_v58 = vadd.f32 %v710_v54, %v921_v49  ;;  %v317_v59 = vpop.f32.mrb[1].mxu0 }
  0xfd   : > { %v940_v60 = vadd.f32 %v722_v57, %v921_v49  ;;  %v357_v62 = vpop.f32.mrb[1].mxu1  ;;  %v318_v63 = vadd.f32 %v921_v49, %v317_v59 }
  0xfe   : > { %v945_v0 = vadd.f32 %v921_v49, %v357_v62  ;;  %397 = vst [vmem:[%s932_s11 + $0x8] sm:$0xff] %v323_v58  ;;  %v464_v1 = vsel %vm448_vm0, %v323_v58, 0.0  ;;  %vm537_vm0 = vcmp.eq.s32.totalorder %v906_v41, 0 }
  0xff   : > { %405 = vst [vmem:[%s932_s11 + $0x48] sm:$0xff] %v940_v60  ;;  %v501_v5 = vmul.f32 %v464_v1, %v464_v1  ;;  %396 = vst [vmem:[%s932_s11] sm:$0xff] %v318_v63  ;;  %v463_v6 = vsel %vm447_vm1, %v318_v63, 0.0  ;;  %v713_v7 = vpop.f32.mrb[2].mxu0  ;;  %v472_v8 = vsel %vm456_vm8, %v940_v60, 0.0  ;;  %vm539_vm1 = vcmp.eq.s32.totalorder %v906_v41, 1 }
 0x100   : > { %404 = vst [vmem:[%s932_s11 + $0x40] sm:$0xff] %v945_v0  ;;  %v725_v9 = vpop.f32.mrb[2].mxu1  ;;  %v479_v10 = vadd.f32 %v464_v1, %v463_v6  ;;  %v500_v11 = vmul.f32 %v463_v6, %v463_v6  ;;  %v333_v12 = vadd.f32 %v713_v7, %v921_v49  ;;  %v327_v13 = vpop.f32.mrb[3].mxu0  ;;  %v471_v1 = vsel %vm455_vm9, %v945_v0, 0.0 }
 0x101   : > { %v367_v15 = vpop.f32.mrb[3].mxu1  ;;  %v328_v16 = vadd.f32 %v921_v49, %v327_v13  ;;  %v969_v17 = vadd.f32 %v725_v9, %v921_v49  ;;  %v427_v7 = vadd.s32 112, %v906_v41  ;;  %v509_v19 = vmul.f32 %v472_v8, %v472_v8 }
 0x102   : > { %v972_v18 = vadd.f32 %v921_v49, %v367_v15  ;;  %v516_v20 = vadd.f32 %v501_v5, %v500_v11  ;;  %399 = vst [vmem:[%s932_s11 + $0x18] sm:$0xff] %v333_v12  ;;  %v466_v22 = vsel %vm450_vm2, %v333_v12, 0.0  ;;  %v444_v11 = vadd.s32 %v910_v43, %v426_v55 }
 0x103   : > { %398 = vst [vmem:[%s932_s11 + $0x10] sm:$0xff] %v328_v16  ;;  %v465_v23 = vsel %vm449_vm3, %v328_v16, 0.0  ;;  %v716_v24 = vpop.f32.mrb[4].mxu0  ;;  %407 = vst [vmem:[%s932_s11 + $0x58] sm:$0xff] %v969_v17  ;;  %v503_v36 = vmul.f32 %v466_v22, %v466_v22  ;;  %v428_v15 = vadd.s32 120, %v906_v41  ;;  %v445_v16 = vadd.s32 %v910_v43, %v427_v7 }
 0x104   : > { %406 = vst [vmem:[%s932_s11 + $0x50] sm:$0xff] %v972_v18  ;;  %v728_v26 = vpop.f32.mrb[4].mxu1  ;;  %v480_v27 = vadd.f32 %v479_v10, %v465_v23  ;;  %v502_v28 = vmul.f32 %v465_v23, %v465_v23  ;;  %v343_v29 = vadd.f32 %v716_v24, %v921_v49  ;;  %v337_v30 = vpop.f32.mrb[5].mxu0  ;;  %v508_v10 = vmul.f32 %v471_v1, %v471_v1 }
 0x105   : > { %v377_v31 = vpop.f32.mrb[5].mxu1  ;;  %v338_v32 = vadd.f32 %v921_v49, %v337_v30  ;;  %v992_v34 = vadd.f32 %v728_v26, %v921_v49  ;;  %v473_v0 = vsel %vm457_vm10, %v972_v18, 0.0  ;;  %v474_v14 = vsel %vm458_vm11, %v969_v17, 0.0 }
 0x106   : > { %v378_v35 = vadd.f32 %v921_v49, %v377_v31  ;;  %v517_v37 = vadd.f32 %v516_v20, %v502_v28  ;;  %401 = vst [vmem:[%s932_s11 + $0x28] sm:$0xff] %v343_v29  ;;  %v481_v38 = vadd.f32 %v480_v27, %v466_v22  ;;  %v468_v39 = vsel %vm452_vm4, %v343_v29, 0.0 }
 0x107   : > { %400 = vst [vmem:[%s932_s11 + $0x20] sm:$0xff] %v338_v32  ;;  %v467_v40 = vsel %vm451_vm5, %v338_v32, 0.0  ;;  %v719_v42 = vpop.f32.mrb[6].mxu0  ;;  %409 = vst [vmem:[%s932_s11 + $0x68] sm:$0xff] %v992_v34  ;;  %v505_v57 = vmul.f32 %v468_v39, %v468_v39  ;;  %v510_v22 = vmul.f32 %v473_v0, %v473_v0  ;;  %vm460_vm13 = vcmp.lt.s32.totalorder %v444_v11, 200 }
 0x108   : > { %408 = vst [vmem:[%s932_s11 + $0x60] sm:$0xff] %v378_v35  ;;  %v731_v46 = vpop.f32.mrb[6].mxu1  ;;  %v482_v47 = vadd.f32 %v481_v38, %v467_v40  ;;  %v504_v48 = vmul.f32 %v467_v40, %v467_v40  ;;  %v518_v50 = vadd.f32 %v517_v37, %v503_v36  ;;  %v353_v51 = vadd.f32 %v719_v42, %v921_v49  ;;  %v347_v52 = vpop.f32.mrb[7].mxu0 }
 0x109   : > { %v387_v53 = vpop.f32.mrb[7].mxu1  ;;  %v348_v54 = vadd.f32 %v921_v49, %v347_v52  ;;  %v393_v56 = vadd.f32 %v731_v46, %v921_v49  ;;  %v475_v60 = vsel %vm459_vm12, %v378_v35, 0.0  ;;  %v446_v24 = vadd.s32 %v910_v43, %v428_v15 }
 0x10a   : > { %v519_v58 = vadd.f32 %v518_v50, %v504_v48  ;;  %403 = vst [vmem:[%s932_s11 + $0x38] sm:$0xff] %v353_v51  ;;  %v483_v59 = vadd.f32 %v482_v47, %v468_v39  ;;  %v388_v61 = vadd.f32 %v921_v49, %v387_v53  ;;  %v470_v62 = vsel %vm454_vm6, %v353_v51, 0.0 }
 0x10b   : > { %402 = vst [vmem:[%s932_s11 + $0x30] sm:$0xff] %v348_v54  ;;  %v469_v63 = vsel %vm453_vm7, %v348_v54, 0.0  ;;  %411 = vst [vmem:[%s932_s11 + $0x78] sm:$0xff] %v393_v56  ;;  %v507_v49 = vmul.f32 %v470_v62, %v470_v62  ;;  %vm461_vm14 = vcmp.lt.s32.totalorder %v445_v16, 200  ;;  %v511_v25 = vmul.f32 %v474_v14, %v474_v14 }
 0x10c   : > { %v484_v4 = vadd.f32 %v483_v59, %v469_v63  ;;  %v506_v5 = vmul.f32 %v469_v63, %v469_v63  ;;  %v520_v6 = vadd.f32 %v519_v58, %v505_v57  ;;  %410 = vst [vmem:[%s932_s11 + $0x70] sm:$0xff] %v388_v61  ;;  %v512_v28 = vmul.f32 %v475_v60, %v475_v60 }
 0x10d   : > { %v476_v29 = vsel %vm460_vm13, %v992_v34, 0.0  ;;  %v477_v30 = vsel %vm461_vm14, %v388_v61, 0.0  ;;  %vm462_vm15 = vcmp.lt.s32.totalorder %v446_v24, 200 }
 0x10e   : > { %v521_v3 = vadd.f32 %v520_v6, %v506_v5  ;;  %v485_v9 = vadd.f32 %v484_v4, %v470_v62  ;;  %v513_v33 = vmul.f32 %v476_v29, %v476_v29  ;;  %v514_v35 = vmul.f32 %v477_v30, %v477_v30 }
 0x10f   : > { %v478_v37 = vsel %vm462_vm15, %v393_v56, 0.0 }
 0x110   : > { %v486_v12 = vadd.f32 %v485_v9, %v471_v1  ;;  %v522_v13 = vadd.f32 %v521_v3, %v507_v49  ;;  %v515_v39 = vmul.f32 %v478_v37, %v478_v37 }
 0x112   : > { %v523_v20 = vadd.f32 %v522_v13, %v508_v10  ;;  %v487_v21 = vadd.f32 %v486_v12, %v472_v8 }
 0x114   : > { %v488_v23 = vadd.f32 %v487_v21, %v473_v0  ;;  %v524_v18 = vadd.f32 %v523_v20, %v509_v19 }
 0x116   : > { %v525_v26 = vadd.f32 %v524_v18, %v510_v22  ;;  %v489_v27 = vadd.f32 %v488_v23, %v474_v14 }
 0x118   : > { %v490_v31 = vadd.f32 %v489_v27, %v475_v60  ;;  %v526_v32 = vadd.f32 %v525_v26, %v511_v25 }
 0x11a   : > { %v527_v17 = vadd.f32 %v526_v32, %v512_v28  ;;  %v491_v36 = vadd.f32 %v490_v31, %v476_v29 }
 0x11c   : > { %v492_v38 = vadd.f32 %v491_v36, %v477_v30  ;;  %v528_v43 = vadd.f32 %v527_v17, %v513_v33 }
 0x11e   : > { %v493_v40 = vadd.f32 %v492_v38, %v478_v37  ;;  %v529_v42 = vadd.f32 %v528_v43, %v514_v35 }
 0x120   : > { %v494_v44 = vrot.slane %v493_v40, 4  ;;  %v530_v45 = vadd.f32 %v529_v42, %v515_v39 }
 0x122   : > { %v495_v46 = vadd.f32 %v494_v44, %v493_v40  ;;  %v531_v34 = vrot.slane %v530_v45, 4 }
 0x124   : > { %v496_v47 = vrot.slane %v495_v46, 2  ;;  %v532_v48 = vadd.f32 %v531_v34, %v530_v45 }
 0x126   : > { %v497_v50 = vadd.f32 %v496_v47, %v495_v46  ;;  %v533_v51 = vrot.slane %v532_v48, 2 }
 0x128   : > { %v498_v52 = vrot.slane %v497_v50, 1  ;;  %v534_v53 = vadd.f32 %v533_v51, %v532_v48 }
 0x12a   : > { %v499_v54 = vadd.f32 %v498_v52, %v497_v50  ;;  %v535_v55 = vrot.slane %v534_v53, 1 }
 0x12c   : > { %v536_v56 = vadd.f32 %v535_v55, %v534_v53  ;;  %v538_v57 = vsel %vm537_vm0, %v499_v54, 0.0 }
 0x12e   : > { %v540_v58 = vsel %vm539_vm1, %v536_v56, 0.0 }
 0x12f   : > { %v541_v59 = vadd.f32 %v540_v58, %v538_v57 }
 0x131   : > { %542 = vst [vmem:[%s211_s13] sm:$0xff] %v541_v59 }
 0x132 PF: > { %s15_s15 = sadd.s32 1, %s794_s15  }
 0x133   : > { %p12_p5 = scmp.ge.s32.totalorder %s15_s15, 4  }
 0x135   :  { %14 = sbr.rel (!%p12_p5) target bundleno = 1 (0x1), region = 74 }

</bundles_post_ra>
